<compile_context>
chip_gen: v7x
topology: tpu7x:2x2x1
jax: 0.10.0
libtpu: 0.0.40
codegen_flags: <defaults>
</compile_context>

<pallas_src>
import math

import jax
import jax.numpy as jnp
from jax.experimental import pallas as pl
from jax.experimental.pallas import tpu as pltpu


# ------------------------------ kernels --------------------------------------


def _norm_full_kernel(x_ref, mean_ref, std_ref, o_ref):
    # Cast fused in-kernel (free on the VPU in this mem-bound kernel; avoids a
    # separate whole-array XLA convert / extra HBM pass for narrow inputs).
    x = x_ref[...].astype(o_ref.dtype)
    # True divide (not a precomputed reciprocal) to match PyTorch's
    # (x - mean) / std exactly; the divide is hidden behind the DMA anyway.
    o_ref[...] = (x - mean_ref[...]) / std_ref[...]


def _norm_meanonly_kernel(x_ref, mean_ref, o_ref):
    o_ref[...] = x_ref[...].astype(o_ref.dtype) - mean_ref[...]


# --------------------------- tiling policy ------------------------------------

_MIB = 1024 * 1024


def _chip_budgets():
    """(target_input_block_bytes, vmem_limit_cap, min_grid_steps) per chip gen."""
    vmem_phys = None
    try:
        info = pltpu.get_tpu_info()
        vmem_phys = getattr(info, "vmem_capacity_bytes", None)
    except Exception:
        vmem_phys = None
    if vmem_phys is None:
        vmem_phys = 64 * _MIB  # conservative default
    if vmem_phys <= 64 * _MIB:
        # v7x-class: 64 MiB VMEM/TC, ~3.2 TB/s HBM, 2 TCs.  Big blocks so the
        # ~0.35us fixed per-step overhead drops below ~10%, and >=2 grid steps
        # so the "parallel" axis can shard across both TensorCores.
        return 8 * _MIB, 44 * _MIB, 2
    # v5e / v6e: 128 MiB VMEM, single TensorCore.  4 MiB blocks sit on the
    # measured ~86% HBM-roofline plateau; only a few steps needed for priming.
    return 4 * _MIB, 96 * _MIB, 3


def _sublane_multiple(dtype) -> int:
    """Row-tile granularity matching the dtype's sublane packing."""
    bits = jnp.dtype(dtype).itemsize * 8
    return max(8, 256 // bits)  # 8 (f32), 16 (bf16), 32 (int8/fp8)


def _round_up(n, m):
    return ((n + m - 1) // m) * m


def _pick_tiles(batch, hidden, in_itemsize, sublane, target_bytes, min_steps):
    """Pick (tb, th): row-tile and column-tile sizes for the streamed blocks."""
    if hidden * in_itemsize * sublane > target_bytes and hidden > 256:
        # Very wide rows: split hidden into lane-aligned tiles (2-D grid) so
        # double-buffered in/out blocks stay on budget instead of oversizing.
        tb = sublane
        th = max(128, (target_bytes // (sublane * in_itemsize)) // 128 * 128)
        th = min(th, _round_up(hidden, 128))
        return tb, th

    th = hidden
    tb = target_bytes // max(1, hidden * in_itemsize)
    tb = max(sublane, (tb // sublane) * sublane)
    if batch >= min_steps * sublane:
        cap = max(sublane, (batch // min_steps // sublane) * sublane)
        # Only shrink for step count while blocks stay >= ~1 MiB; below that
        # per-step overhead dominates, so prioritize the byte budget instead.
        if cap * hidden * in_itemsize >= _MIB:
            tb = min(tb, cap)
    tb = min(tb, _round_up(batch, sublane))
    return tb, th


# --------------------------- pallas_call builder ------------------------------


def _launch(kernel, x2, *stats):
    batch, hidden = x2.shape
    out_dtype = stats[0].dtype  # stats are pre-promoted to the output dtype
    in_itemsize = x2.dtype.itemsize
    out_itemsize = jnp.dtype(out_dtype).itemsize
    sublane = _sublane_multiple(x2.dtype)

    target_bytes, vmem_cap, min_steps = _chip_budgets()
    tb, th = _pick_tiles(batch, hidden, in_itemsize, sublane, target_bytes,
                         min_steps)

    grid_b = pl.cdiv(batch, tb)
    grid_h = pl.cdiv(hidden, th)

    # Note: partial edge blocks rely on Pallas masking out-of-bounds rows/cols
    # on writeback; the padded x values fed through the arithmetic are never
    # stored (keep this in mind before any refactor to manual DMA).
    if grid_h == 1:
        grid = (grid_b,)
        x_spec = pl.BlockSpec((tb, hidden), lambda i: (i, 0))
        # Constant block index -> the stat rows are DMA'd once and stay resident.
        stat_spec = pl.BlockSpec((1, hidden), lambda i: (0, 0))
        out_spec = pl.BlockSpec((tb, hidden), lambda i: (i, 0))
        dims = ("parallel",)
    else:
        grid = (grid_b, grid_h)
        x_spec = pl.BlockSpec((tb, th), lambda i, j: (i, j))
        stat_spec = pl.BlockSpec((1, th), lambda i, j: (0, j))
        out_spec = pl.BlockSpec((tb, th), lambda i, j: (i, j))
        dims = ("parallel", "parallel")

    n_stats = len(stats)
    in_block = tb * th * in_itemsize
    out_block = tb * th * out_itemsize
    stat_bytes = n_stats * 2 * th * out_itemsize
    vmem_limit = int(min(vmem_cap,
                         max(16 * _MIB, 4 * (in_block + out_block) + stat_bytes)))

    cost = pl.CostEstimate(
        flops=(1 + n_stats) * batch * hidden,
        transcendentals=0,
        bytes_accessed=batch * hidden * (in_itemsize + out_itemsize)
        + n_stats * hidden * out_itemsize,
    )

    return pl.pallas_call(
        kernel,
        out_shape=jax.ShapeDtypeStruct((batch, hidden), out_dtype),
        grid_spec=pltpu.PrefetchScalarGridSpec(
            num_scalar_prefetch=0,
            grid=grid,
            in_specs=[x_spec] + [stat_spec] * n_stats,
            out_specs=out_spec,
        ),
        compiler_params=pltpu.CompilerParams(
            dimension_semantics=dims,
            vmem_limit_bytes=vmem_limit,
        ),
        cost_estimate=cost,
        # TODO(synk): if xprof shows exposed DMA on v7x after the block-size
        # bump, sweep pipeline_mode=pl.Buffered(3) on x_spec / out_spec.
    )(x2, *stats)


@jax.jit
def _normalize_full(x2, mean2, std2):
    return _launch(_norm_full_kernel, x2, mean2, std2)


@jax.jit
def _normalize_meanonly(x2, mean2):
    return _launch(_norm_meanonly_kernel, x2, mean2)


# ------------------------------- wrapper --------------------------------------


class Normalizer:
    """JAX/Pallas port of elk's Normalizer (BatchNorm-ish buffers)."""

    def __init__(self, normalized_shape, *, dtype=jnp.float32, eps=1e-5,
                 mode="full"):
        assert mode in ("none", "meanonly", "full")
        self.eps = eps
        self.mode = mode
        self.normalized_shape = tuple(normalized_shape)
        self.mean = jnp.zeros(self.normalized_shape, dtype=dtype)
        self.std = (jnp.ones(self.normalized_shape, dtype=dtype)
                    if mode == "full" else None)

    # fit() is statistics bookkeeping, not the forward hot path: plain JAX.
    def fit(self, x):
        num_dims = len(self.normalized_shape)
        if x.shape[-num_dims:] != self.normalized_shape:
            raise ValueError(
                f"Expected trailing sizes {self.normalized_shape} but got "
                f"{x.shape[-num_dims:]}")
        if self.mode == "none":
            return
        dims = tuple(range(x.ndim - num_dims))
        if self.std is None:
            self.mean = jnp.mean(x, axis=dims).astype(self.mean.dtype)
        else:
            mean = jnp.mean(x, axis=dims)
            # torch.var_mean defaults to the unbiased estimator (ddof=1); a
            # single-sample fit therefore gives NaN std, same as the reference.
            var = jnp.var(x, axis=dims, ddof=1)
            self.mean = mean.astype(self.mean.dtype)
            self.std = jnp.sqrt(var + self.eps).astype(self.std.dtype)

    def __call__(self, x):
        if self.mode == "none":
            return x
        num_dims = len(self.normalized_shape)
        hidden = math.prod(self.normalized_shape)
        batch = max(1, math.prod(x.shape[:-num_dims]))

        # Match torch's type promotion of (x - mean) / std.  x keeps its native
        # dtype into the kernel (cast fused on the VPU); only the tiny stat
        # rows are promoted here.
        out_dtype = jnp.result_type(x.dtype, self.mean.dtype)
        mean_flat = self.mean.reshape(-1).astype(out_dtype)
        std_flat = (self.std.reshape(-1).astype(out_dtype)
                    if self.mode == "full" else None)

        # Lane-dense layout: if hidden isn't a multiple of 128, fold whole rows
        # into the lane axis (free reshape of contiguous x; only the H-length
        # stat rows get tiled) so output stores are unmasked full-lane vst.
        fold = 1
        if hidden % 128 != 0:
            f = math.lcm(hidden, 128) // hidden
            if f > 1 and batch % f == 0:
                fold = f
        rows = batch // fold
        cols = hidden * fold

        x2 = x.reshape(rows, cols)  # native dtype; promotion happens in-kernel
        mean2 = jnp.tile(mean_flat, fold).reshape(1, cols)
        if self.mode == "meanonly":
            out2 = _normalize_meanonly(x2, mean2)
        else:
            std2 = jnp.tile(std_flat, fold).reshape(1, cols)
            out2 = _normalize_full(x2, mean2, std2)
        return out2.reshape(x.shape)


# ----------------------------- demo / check -----------------------------------

if __name__ == "__main__":
    key = jax.random.PRNGKey(0)
    k1, k2, k3, k4 = jax.random.split(key, 4)
    ok = True

    # 1) mode="full": lane-dense hidden (batch=16, hidden=128), 1-D grid.
    x = jax.random.normal(k1, (16, 128), dtype=jnp.float32) * 2.0 + 0.5
    nf = Normalizer((128,), mode="full")
    nf.fit(x)
    y = jax.block_until_ready(nf(x))
    ref = (x - nf.mean[None, :]) / nf.std[None, :]
    ok &= bool(jnp.allclose(y, ref, atol=1e-5, rtol=1e-5))

    # 2) mode="meanonly": small non-128 hidden, flattened batch (15) not
    #    divisible by the fold factor -> masked partial-lane fallback path.
    x3 = jax.random.normal(k2, (3, 5, 32), dtype=jnp.float32)
    nm = Normalizer((32,), mode="meanonly")
    nm.fit(x3)
    y3 = jax.block_until_ready(nm(x3))
    ok &= bool(jnp.allclose(y3, x3 - nm.mean[None, None, :],
                            atol=1e-5, rtol=1e-5))

    # 3) mode="full": small hidden folded into a lane-dense (rows, 128) layout.
    x4 = jax.random.normal(k3, (2, 8, 32), dtype=jnp.float32) + 1.0
    nfold = Normalizer((32,), mode="full")
    nfold.fit(x4)
    y4 = jax.block_until_ready(nfold(x4))
    ref4 = (x4 - nfold.mean) / nfold.std
    ok &= bool(jnp.allclose(y4, ref4, atol=1e-5, rtol=1e-5))

    # 4) mixed dtype: bf16 activations + f32 buffers -> cast fused in-kernel,
    #    promoted f32 output (matches torch type promotion).
    xb = (jax.random.normal(k4, (16, 256), dtype=jnp.float32) * 1.5
          ).astype(jnp.bfloat16)
    nbf = Normalizer((256,), mode="full", dtype=jnp.float32)
    nbf.fit(xb)
    yb = jax.block_until_ready(nbf(xb))
    refb = (xb.astype(jnp.float32) - nbf.mean[None, :]) / nbf.std[None, :]
    ok &= bool(yb.dtype == jnp.float32)
    ok &= bool(jnp.allclose(yb, refb, atol=1e-5, rtol=1e-5))

    # 5) mode="none": identity, no kernel launch.
    nnone = Normalizer((128,), mode="none")
    ok &= bool(jnp.allclose(nnone(x), x))

    print("KERNEL_OK" if ok else "KERNEL_MISMATCH")
</pallas_src>

<mosaic_0001>
module attributes {stable_mosaic.version = 11 : i64} {
  func.func @_norm_full_kernel(%arg0: i32, %arg1: memref<16x128xf32, #tpu.memory_space<vmem>>, %arg2: memref<1x128xf32, #tpu.memory_space<vmem>>, %arg3: memref<1x128xf32, #tpu.memory_space<vmem>>, %arg4: memref<16x128xf32, #tpu.memory_space<vmem>>) attributes {dimension_semantics = [#tpu.dimension_semantics<parallel>], iteration_bounds = array<i64: 1>, scalar_prefetch = 0 : i64, scratch_operands = 0 : i64, tpu.core_type = #tpu.core_type<tc>, window_params = [{transform_indices = @transform_0, window_bounds = array<i64: 16, 128>}, {pipeline_mode = #tpu.pipeline_mode<synchronous>, transform_indices = @transform_1, window_bounds = array<i64: 1, 128>}, {pipeline_mode = #tpu.pipeline_mode<synchronous>, transform_indices = @transform_2, window_bounds = array<i64: 1, 128>}, {transform_indices = @transform_3, window_bounds = array<i64: 16, 128>}]} {
    %c0 = arith.constant 0 : index
    %c0_0 = arith.constant 0 : index
    %0 = vector.load %arg1[%c0, %c0_0] : memref<16x128xf32, #tpu.memory_space<vmem>>, vector<16x128xf32>
    %c0_1 = arith.constant 0 : index
    %c0_2 = arith.constant 0 : index
    %1 = vector.load %arg2[%c0_1, %c0_2] : memref<1x128xf32, #tpu.memory_space<vmem>>, vector<1x128xf32>
    %2 = vector.broadcast %1 : vector<1x128xf32> to vector<16x128xf32>
    %3 = arith.subf %0, %2 : vector<16x128xf32>
    %c0_3 = arith.constant 0 : index
    %c0_4 = arith.constant 0 : index
    %4 = vector.load %arg3[%c0_3, %c0_4] : memref<1x128xf32, #tpu.memory_space<vmem>>, vector<1x128xf32>
    %5 = vector.broadcast %4 : vector<1x128xf32> to vector<16x128xf32>
    %6 = arith.divf %3, %5 : vector<16x128xf32>
    %c0_5 = arith.constant 0 : index
    %c0_6 = arith.constant 0 : index
    %7 = vector.load %arg4[%c0_5, %c0_6] : memref<16x128xf32, #tpu.memory_space<vmem>>, vector<16x128xf32>
    tpu.vector_store %arg4[%c0_5, %c0_6], %6 {strides = array<i32>} : memref<16x128xf32, #tpu.memory_space<vmem>>, vector<16x128xf32>,
    return
  }
  func.func @transform_0(%arg0: i32) -> (i32, i32) {
    %c0_i32 = arith.constant 0 : i32
    %c0_i32_0 = arith.constant 0 : i32
    return %arg0, %c0_i32 : i32, i32
  }
  func.func @transform_1(%arg0: i32) -> (i32, i32) {
    %c0_i32 = arith.constant 0 : i32
    %c0_i32_0 = arith.constant 0 : i32
    %c0_i32_1 = arith.constant 0 : i32
    return %c0_i32, %c0_i32_0 : i32, i32
  }
  func.func @transform_2(%arg0: i32) -> (i32, i32) {
    %c0_i32 = arith.constant 0 : i32
    %c0_i32_0 = arith.constant 0 : i32
    %c0_i32_1 = arith.constant 0 : i32
    return %c0_i32, %c0_i32_0 : i32, i32
  }
  func.func @transform_3(%arg0: i32) -> (i32, i32) {
    %c0_i32 = arith.constant 0 : i32
    %c0_i32_0 = arith.constant 0 : i32
    return %arg0, %c0_i32 : i32, i32
  }
}

</mosaic_0001>

<bundles_post_ra>
// kernel: _normalize_full.1
= control target key start
LH: loop header
LB: loop body
LE: loop exit
PB: predicated region body
PF: predicated region fallthrough
CT: control target
= control target key end

     0   :  { %8 = vsyncpa [#allocation3], 0  ;;  %s185_s0 = inlined_call_operand.hbm [shape: f32[16,128], index: 0, kind: input, shape index: {}]   ;;  %s186_s1 = inlined_call_operand.vmem [shape: f32[1,128], index: 1, kind: input, shape index: {}]   ;;  %s187_s2 = inlined_call_operand.vmem [shape: f32[1,128], index: 2, kind: input, shape index: {}]   ;;  %s188_s3 = inlined_call_operand.hbm [shape: f32[16,128], index: 3, kind: output, shape index: {}]  }
   0x1   :  { %9 = vsyncpa [#allocation4], 0  ;;  %s125_s12 = smov [#allocation2]   ;;  %s77_s16 = scalar_lea.hbm %s185_s0, 256 }
   0x2   :  { %s15_s13 = sshll.u32 %s125_s12, 4  ;;  %p78_p0 = scmp.ne.s32.totalorder %s185_s0, %s77_s16  ;;  %s16_s13 = int_to_ptr.vmem [resolvable:$true] %s15_s13 }
   0x3   :  { %p81_p1 = scmp.lt.u32.totalorder %s77_s16, %s185_s0 }
   0x5   :  { %p83_p2 = pnand %p81_p1, %p78_p0 }
   0x7   :  { %86 = shalt.err (!%p83_p2)
}
   0x8   :  { %s87_s21 = scalar_lea.vmem %s16_s13, 256  ;;  %p92_p4 = scmp.lt.s32.totalorder %s16_s13, %s16_s13 }
   0x9   :  { %p88_p3 = scmp.ne.s32.totalorder %s16_s13, %s87_s21  ;;  %p93_p5 = scmp.lt.s32.totalorder %s87_s21, %s87_s21 }
   0xb   :  { %p94_p6 = por %p93_p5, %p92_p4 }
   0xd   :  { %p95_p7 = pnand %p94_p6, %p88_p3 }
   0xf   :  { %98 = shalt.err (!%p95_p7)
}
  0x10   :  { %s126_s22 = smov 128   ;;  %s127_s23 = smov 8  }
  0x11   :  { %21 = dma.hbm_to_vmem [thread:$0]  %s185_s0, 256, %s16_s13, [#allocation3], %s126_s22, %s126_s22, %s127_s23  }
  0x12   :  { %121 = dma.done.wait [#allocation3], 256  }
  0x13   :  { %122 = vsyncadd [#allocation3], 4294967040  ;;  %v70_v0 = vld [vmem:[%s187_s2] ss:$0 sm:$0xff]  ;;  %v30_v3 = vld [vmem:[#allocation2 + $0x8] sm:$0xff]  ;;  %s128_s30 = smov [#allocation5]  }
  0x14   :  { %75 = vrcp.f32 %v70_v0  ;;  %v29_v1 = vld [vmem:[#allocation2] sm:$0xff]  ;;  %s57_s4 = sshll.u32 %s128_s30, 4  ;;  %s58_s4 = int_to_ptr.vmem [resolvable:$true] %s57_s4 }
  0x15   :  { %v69_v2 = vld [vmem:[%s186_s1] ss:$0 sm:$0xff]  ;;  %s99_s0 = scalar_lea.vmem %s58_s4, 256  ;;  %p104_p9 = scmp.lt.s32.totalorder %s58_s4, %s58_s4 }
  0x16   :  { %v38_v4 = vsub.f32 %v29_v1, %v69_v2  ;;  %v39_v5 = vsub.f32 %v30_v3, %v69_v2  ;;  %p100_p8 = scmp.ne.s32.totalorder %s58_s4, %s99_s0  ;;  %p105_p10 = scmp.lt.s32.totalorder %s99_s0, %s99_s0 }
  0x18   :  { %p106_p11 = por %p105_p10, %p104_p9 }
  0x1a   :  { %p107_p12 = pnand %p106_p11, %p100_p8 }
  0x1e   :  { %v76_v6 = vpop.eup %75 }
  0x1f   :  { %v48_v7 = vmul.f32 %v76_v6, %v38_v4  ;;  %v49_v8 = vmul.f32 %v76_v6, %v39_v5 }
  0x21   :  { %50 = vst [vmem:[#allocation5] sm:$0xff] %v48_v7  ;;  %51 = vst [vmem:[#allocation5 + $0x8] sm:$0xff] %v49_v8 }
  0x22   :  { %110 = shalt.err (!%p107_p12)
}
  0x23   :  { %s111_s5 = scalar_lea.hbm %s188_s3, 256 }
  0x24   :  { %p112_p13 = scmp.ne.s32.totalorder %s188_s3, %s111_s5  ;;  %p115_p0 = scmp.lt.u32.totalorder %s111_s5, %s188_s3 }
  0x26   :  { %p117_p1 = pnand %p115_p0, %p112_p13 }
  0x28   :  { %120 = shalt.err (!%p117_p1)
}
  0x29   :  { %63 = dma.vmem_to_hbm [thread:$0]  %s58_s4, 256, %s188_s3, [#allocation4], %s126_s22, %s126_s22, %s127_s23  }
  0x2a   :  { %123 = dma.done.wait [#allocation4], 256  }
  0x2b   :  { %124 = vsyncadd [#allocation4], 4294967040 }
  0x2c   :  { %67 = vsyncpa [#allocation3], 1 }
  0x2d   :  { %68 = vsyncpa [#allocation4], 1 }

</bundles_post_ra>
